<compile_context>
chip_gen: v7x
topology: tpu7x:2x2x1
jax: 0.10.0
libtpu: 0.0.40
codegen_flags: <defaults>
</compile_context>

<pallas_src>
import jax
import jax.numpy as jnp
from jax.experimental import pallas as pl
from jax.experimental.pallas import tpu as pltpu

H1 = 128  # fc1 width padded 100 -> 128; row H1-1 is the constant-1 bias row
H2 = 256  # fc2 width padded 200 -> 256


def mlp_kernel(x_ref, w1_ref, b1_ref, w2t_ref, w3_ref, b3_ref, o_ref):
    # x: (1, TB) f32 — batch along lanes.
    x = x_ref[...]

    # fc1 (K=1): outer product on the VPU; MXU would be <1% utilized.
    # Row H1-1 evaluates to exactly 1.0 (w1=0, b1=1, ReLU(1)=1) and carries the
    # folded fc2 bias through the matmul below.
    h1 = jnp.maximum(w1_ref[...] * x + b1_ref[...], 0.0)               # (H1, TB)

    # fc2: the one real matmul — a single (H2, H1) @ (H1, TB) MXU tile.
    # fc2 bias already lives in w2t[:, H1-1]; no separate VPU bias add.
    lhs = w2t_ref[...]
    rhs = h1.astype(lhs.dtype)           # bf16 cast only in bf16 mode
    h2 = jnp.dot(lhs, rhs, preferred_element_type=jnp.float32)         # (H2, TB)
    h2 = jnp.maximum(h2, 0.0)

    # fc3 (N=1): per-column dot product = VPU multiply + XLU sublane reduce.
    o = jnp.sum(h2 * w3_ref[...], axis=0, keepdims=True) + b3_ref[...]  # (1, TB)
    o_ref[...] = o.astype(o_ref.dtype)


def _vmem_capacity_bytes():
    """Physical per-core VMEM; conservative (v7x = 64 MiB) fallback on failure."""
    try:
        return int(pltpu.get_tpu_info().vmem_capacity_bytes)
    except Exception:
        return 64 * 1024 * 1024


def net_forward(x, params, tb_max=4096, use_bf16_matmul=True):
    """x: (B, 1) f32.  Returns (B, 1) f32 (matches torch's x[:, None][:, 0])."""
    w1, b1, w2, b2, w3, b3 = params
    B = int(x.shape[0])

    # --- repack weights into kernel layout (done once, outside the kernel) ---
    w1c = jnp.pad(w1, ((0, 0), (0, H1 - w1.shape[1]))).T                 # (H1, 1)
    b1c = jnp.pad(b1, ((0, 0), (0, H1 - b1.shape[1]))).T                 # (H1, 1)
    b1c = b1c.at[H1 - 1, 0].set(1.0)          # constant-1 row (w1c row stays 0)
    w2t = jnp.pad(w2, ((0, H1 - w2.shape[0]), (0, H2 - w2.shape[1]))).T  # (H2, H1)
    w2t = w2t.at[: w2.shape[1], H1 - 1].set(b2[0, :])     # fold fc2 bias into MXU
    w3c = jnp.pad(w3, ((0, H2 - w3.shape[0]), (0, 0)))                   # (H2, 1)
    b3s = b3.reshape(1, 1)                                               # (1, 1)
    if use_bf16_matmul:
        w2t = w2t.astype(jnp.bfloat16)        # opt-in perf mode (~1e-2 numerics)

    # --- batch tiling: lane-dense tiles, pipelined over the grid -------------
    tb_max = max(128, (int(tb_max) // 128) * 128)         # keep (·,128)-legal
    cap = _vmem_capacity_bytes()
    # Keep f32 intermediates (~3 KiB / batch element) well under VMEM capacity.
    tb_cap = max(128, (((cap // 2) // (3 * 1024)) // 128) * 128)
    # Prefer >= 2 tiles when the batch allows so both v7x TensorCores engage.
    tb_half = max(128, ((-(-B // 2) + 127) // 128) * 128)
    TB = int(min(tb_max, tb_cap, tb_half))
    num_tiles = -(-B // TB)
    B_pad = num_tiles * TB

    x_row = jnp.pad(x[:, 0], (0, B_pad - B)).reshape(1, B_pad)           # (1, B_pad)

    const = lambda shape: pl.BlockSpec(shape, lambda i: (0, 0))

    # Raise the scoped VMEM limit (v5e default is only 16 MiB) but stay well
    # under v7x's 64 MiB physical VMEM.
    vmem_limit = int(min(cap - (8 << 20),
                         max(32 << 20, TB * 6 * 1024 + (4 << 20))))

    out = pl.pallas_call(
        mlp_kernel,
        out_shape=jax.ShapeDtypeStruct((1, B_pad), jnp.float32),
        grid=(num_tiles,),
        in_specs=[
            pl.BlockSpec((1, TB), lambda i: (0, i)),   # x: blocked over batch
            const(w1c.shape), const(b1c.shape),        # weights: VMEM-resident
            const(w2t.shape),
            const(w3c.shape), const(b3s.shape),
        ],
        out_specs=pl.BlockSpec((1, TB), lambda i: (0, i)),
        compiler_params=pltpu.CompilerParams(
            dimension_semantics=("parallel",),          # megacore on v7x
            vmem_limit_bytes=vmem_limit),
    )(x_row, w1c, b1c, w2t, w3c, b3s)

    return out[0, :B].reshape(B, 1)


def init_params(key):
    """Deterministic init matching torch.nn.Linear default U(-1/sqrt(fan_in), +1/sqrt(fan_in))."""
    dims = [(1, 100), (100, 200), (200, 1)]
    params = []
    for (fan_in, fan_out) in dims:
        key, kw, kb = jax.random.split(key, 3)
        bound = 1.0 / jnp.sqrt(float(fan_in))
        w = jax.random.uniform(kw, (fan_in, fan_out), jnp.float32, -bound, bound)
        b = jax.random.uniform(kb, (1, fan_out), jnp.float32, -bound, bound)
        params.extend([w, b])
    return tuple(params)


def reference_forward(x, params):
    w1, b1, w2, b2, w3, b3 = params
    h1 = jnp.maximum(x @ w1 + b1, 0.0)
    h2 = jnp.maximum(h1 @ w2 + b2, 0.0)
    return h2 @ w3 + b3


if __name__ == "__main__":
    key = jax.random.PRNGKey(0)
    key, kx1, kx2 = jax.random.split(key, 3)
    params = init_params(key)

    # 1) Small batch, single tile, exact f32 path (matches PyTorch numerics).
    x_small = jax.random.normal(kx1, (8, 1), jnp.float32)
    out_f32 = jax.block_until_ready(
        net_forward(x_small, params, use_bf16_matmul=False))
    ref_small = reference_forward(x_small, params)
    assert out_f32.shape == (8, 1), out_f32.shape
    assert jnp.allclose(out_f32, ref_small, atol=2e-5, rtol=2e-5), (out_f32, ref_small)

    # 2) Larger batch: exercises multi-tile grid + padding + bf16 fc2 perf path.
    x_multi = jax.random.normal(kx2, (300, 1), jnp.float32)
    out_bf16 = jax.block_until_ready(
        net_forward(x_multi, params, use_bf16_matmul=True))
    ref_multi = reference_forward(x_multi, params)
    assert out_bf16.shape == (300, 1), out_bf16.shape
    assert jnp.allclose(out_bf16, ref_multi, atol=5e-2, rtol=5e-2), (
        float(jnp.max(jnp.abs(out_bf16 - ref_multi))))

    print("KERNEL_OK")
</pallas_src>

<mosaic_0001>
module attributes {stable_mosaic.version = 11 : i64} {
  func.func @mlp_kernel(%arg0: i32, %arg1: memref<1x128xf32, #tpu.memory_space<vmem>>, %arg2: memref<128x1xf32, #tpu.memory_space<vmem>>, %arg3: memref<128x1xf32, #tpu.memory_space<vmem>>, %arg4: memref<256x128xf32, #tpu.memory_space<vmem>>, %arg5: memref<256x1xf32, #tpu.memory_space<vmem>>, %arg6: memref<1x1xf32, #tpu.memory_space<vmem>>, %arg7: memref<1x128xf32, #tpu.memory_space<vmem>>) attributes {dimension_semantics = [#tpu.dimension_semantics<parallel>], iteration_bounds = array<i64: 1>, scalar_prefetch = 0 : i64, scratch_operands = 0 : i64, tpu.core_type = #tpu.core_type<tc>, window_params = [{transform_indices = @transform_0, window_bounds = array<i64: 1, 128>}, {pipeline_mode = #tpu.pipeline_mode<synchronous>, transform_indices = @transform_1, window_bounds = array<i64: 128, 1>}, {pipeline_mode = #tpu.pipeline_mode<synchronous>, transform_indices = @transform_2, window_bounds = array<i64: 128, 1>}, {pipeline_mode = #tpu.pipeline_mode<synchronous>, transform_indices = @transform_3, window_bounds = array<i64: 256, 128>}, {pipeline_mode = #tpu.pipeline_mode<synchronous>, transform_indices = @transform_4, window_bounds = array<i64: 256, 1>}, {pipeline_mode = #tpu.pipeline_mode<synchronous>, transform_indices = @transform_5, window_bounds = array<i64: 1, 1>}, {transform_indices = @transform_6, window_bounds = array<i64: 1, 128>}]} {
    %c0 = arith.constant 0 : index
    %c0_0 = arith.constant 0 : index
    %0 = vector.load %arg1[%c0, %c0_0] : memref<1x128xf32, #tpu.memory_space<vmem>>, vector<1x128xf32>
    %c0_1 = arith.constant 0 : index
    %c0_2 = arith.constant 0 : index
    %1 = vector.load %arg2[%c0_1, %c0_2] : memref<128x1xf32, #tpu.memory_space<vmem>>, vector<128x1xf32>
    %2 = vector.broadcast %1 : vector<128x1xf32> to vector<128x128xf32>
    %3 = vector.broadcast %0 : vector<1x128xf32> to vector<128x128xf32>
    %4 = arith.mulf %2, %3 : vector<128x128xf32>
    %c0_3 = arith.constant 0 : index
    %c0_4 = arith.constant 0 : index
    %5 = vector.load %arg3[%c0_3, %c0_4] : memref<128x1xf32, #tpu.memory_space<vmem>>, vector<128x1xf32>
    %6 = vector.broadcast %5 : vector<128x1xf32> to vector<128x128xf32>
    %7 = arith.addf %4, %6 : vector<128x128xf32>
    %cst = arith.constant 0.000000e+00 : f32
    %8 = vector.broadcast %cst : f32 to vector<128x128xf32>
    %9 = arith.maximumf %7, %8 : vector<128x128xf32>
    %c0_5 = arith.constant 0 : index
    %c0_6 = arith.constant 0 : index
    %10 = vector.load %arg4[%c0_5, %c0_6] : memref<256x128xf32, #tpu.memory_space<vmem>>, vector<256x128xf32>
    %cst_7 = arith.constant dense<0.000000e+00> : vector<256x128xf32>
    %11 = tpu.matmul %10, %9, %cst_7 {dimension_numbers = #tpu.dot_dimension_numbers<[1], [0], [0], [1], [0, 0, 1, 1], [], []>} : vector<256x128xf32>, vector<128x128xf32>, vector<256x128xf32> -> vector<256x128xf32>
    %cst_8 = arith.constant 0.000000e+00 : f32
    %12 = vector.broadcast %cst_8 : f32 to vector<256x128xf32>
    %13 = arith.maximumf %11, %12 : vector<256x128xf32>
    %c0_9 = arith.constant 0 : index
    %c0_10 = arith.constant 0 : index
    %14 = vector.load %arg5[%c0_9, %c0_10] : memref<256x1xf32, #tpu.memory_space<vmem>>, vector<256x1xf32>
    %15 = vector.broadcast %14 : vector<256x1xf32> to vector<256x128xf32>
    %16 = arith.mulf %13, %15 : vector<256x128xf32>
    %cst_11 = arith.constant dense<0.000000e+00> : vector<128xf32>
    %17 = vector.multi_reduction <add>, %16, %cst_11 [0] : vector<256x128xf32> to vector<128xf32>
    %18 = vector.shape_cast %17 : vector<128xf32> to vector<1x128xf32>
    %c0_12 = arith.constant 0 : index
    %c0_13 = arith.constant 0 : index
    %19 = vector.load %arg6[%c0_12, %c0_13] : memref<1x1xf32, #tpu.memory_space<vmem>>, vector<1x1xf32>
    %20 = vector.broadcast %19 : vector<1x1xf32> to vector<1x128xf32>
    %21 = arith.addf %18, %20 : vector<1x128xf32>
    %c0_14 = arith.constant 0 : index
    %c0_15 = arith.constant 0 : index
    %22 = vector.load %arg7[%c0_14, %c0_15] : memref<1x128xf32, #tpu.memory_space<vmem>>, vector<1x128xf32>
    tpu.vector_store %arg7[%c0_14, %c0_15], %21 {strides = array<i32>} : memref<1x128xf32, #tpu.memory_space<vmem>>, vector<1x128xf32>,
    return
  }
  func.func @transform_0(%arg0: i32) -> (i32, i32) {
    %c0_i32 = arith.constant 0 : i32
    %c0_i32_0 = arith.constant 0 : i32
    return %c0_i32, %arg0 : i32, i32
  }
  func.func @transform_1(%arg0: i32) -> (i32, i32) {
    %c0_i32 = arith.constant 0 : i32
    %c0_i32_0 = arith.constant 0 : i32
    %c0_i32_1 = arith.constant 0 : i32
    return %c0_i32, %c0_i32_0 : i32, i32
  }
  func.func @transform_2(%arg0: i32) -> (i32, i32) {
    %c0_i32 = arith.constant 0 : i32
    %c0_i32_0 = arith.constant 0 : i32
    %c0_i32_1 = arith.constant 0 : i32
    return %c0_i32, %c0_i32_0 : i32, i32
  }
  func.func @transform_3(%arg0: i32) -> (i32, i32) {
    %c0_i32 = arith.constant 0 : i32
    %c0_i32_0 = arith.constant 0 : i32
    %c0_i32_1 = arith.constant 0 : i32
    return %c0_i32, %c0_i32_0 : i32, i32
  }
  func.func @transform_4(%arg0: i32) -> (i32, i32) {
    %c0_i32 = arith.constant 0 : i32
    %c0_i32_0 = arith.constant 0 : i32
    %c0_i32_1 = arith.constant 0 : i32
    return %c0_i32, %c0_i32_0 : i32, i32
  }
  func.func @transform_5(%arg0: i32) -> (i32, i32) {
    %c0_i32 = arith.constant 0 : i32
    %c0_i32_0 = arith.constant 0 : i32
    %c0_i32_1 = arith.constant 0 : i32
    return %c0_i32, %c0_i32_0 : i32, i32
  }
  func.func @transform_6(%arg0: i32) -> (i32, i32) {
    %c0_i32 = arith.constant 0 : i32
    %c0_i32_0 = arith.constant 0 : i32
    return %c0_i32, %arg0 : i32, i32
  }
}

</mosaic_0001>

<bundles_post_ra>
// kernel: tpu_custom_call.1
= control target key start
LH: loop header
LB: loop body
LE: loop exit
PB: predicated region body
PF: predicated region fallthrough
CT: control target
= control target key end

     0   :  { %s1472_s0 = inlined_call_operand.vmem [shape: f32[1,128], index: 0, kind: input, shape index: {}]   ;;  %s1473_s1 = inlined_call_operand.vmem [shape: f32[128,1], index: 1, kind: input, shape index: {}]   ;;  %s1474_s2 = inlined_call_operand.vmem [shape: f32[128,1], index: 2, kind: input, shape index: {}]   ;;  %s1475_s3 = inlined_call_operand.vmem [shape: f32[256,128], index: 3, kind: input, shape index: {}]   ;;  %s1476_s4 = inlined_call_operand.vmem [shape: f32[256,1], index: 4, kind: input, shape index: {}]   ;;  %s1477_s5 = inlined_call_operand.<no memory space> [shape: f32[1,1], index: 5, kind: input, shape index: {}]   ;;  %s1478_s6 = inlined_call_operand.hbm [shape: f32[1,128], index: 6, kind: output, shape index: {}]  }
   0x1   :  { %v11_v0 = vstv %s1477_s5 }
   0x2   :  { %12 = vst [vmem:[#allocation2] sm:$0x1] %v11_v0 }
   0x3   :  { %v145_v1 = vld [vmem:[%s1474_s2] sm:$0xff]  ;;  %v1054_v3 = vmov 0   ;;  %v146_v4 = vld [vmem:[%s1474_s2 + $0x8] sm:$0xff]  ;;  %v30_v6 = vld [vmem:[%s1473_s1 + $0x18] sm:$0xff] }
   0x4   :  { %v27_v2 = vld [vmem:[%s1473_s1] sm:$0xff]  ;;  %1029 = vset.pattern.permute.xlu1 %v1054_v3  ;;  %1028 = vset.pattern.permute.xlu0 %v1054_v3  ;;  %v28_v5 = vld [vmem:[%s1473_s1 + $0x8] sm:$0xff]  ;;  %v29_v7 = vld [vmem:[%s1473_s1 + $0x10] sm:$0xff] }
   0x5   :  { %163 = vperm.xlu1 %1029, %v145_v1   ;;  %45 = vperm.xlu0 %1028, %v27_v2   ;;  %v148_v8 = vld [vmem:[%s1474_s2 + $0x18] sm:$0xff]  ;;  %v147_v9 = vld [vmem:[%s1474_s2 + $0x10] sm:$0xff]  ;;  %v32_v10 = vld [vmem:[%s1473_s1 + $0x28] sm:$0xff] }
   0x6   :  { %v31_v11 = vld [vmem:[%s1473_s1 + $0x20] sm:$0xff]  ;;  %v150_v12 = vld [vmem:[%s1474_s2 + $0x28] sm:$0xff] }
   0x7   :  { %v149_v13 = vld [vmem:[%s1474_s2 + $0x20] sm:$0xff] }
   0x9   :  { %168 = vperm.xlu1 %1029, %v146_v4   ;;  %50 = vperm.xlu0 %1028, %v28_v5  }
   0xd   :  { %60 = vperm.xlu1 %1029, %v30_v6   ;;  %55 = vperm.xlu0 %1028, %v29_v7  }
  0x11   :  { %178 = vperm.xlu1 %1029, %v148_v8   ;;  %173 = vperm.xlu0 %1028, %v147_v9  }
  0x15   :  { %70 = vperm.xlu1 %1029, %v32_v10   ;;  %65 = vperm.xlu0 %1028, %v31_v11  }
  0x19   :  { %188 = vperm.xlu1 %1029, %v150_v12   ;;  %183 = vperm.xlu0 %1028, %v149_v13  }
  0x1a   :  { %13 = vsyncpa [#allocation4], 0  ;;  %v34_v14 = vld [vmem:[%s1473_s1 + $0x38] sm:$0xff]  ;;  %v33_v15 = vld [vmem:[%s1473_s1 + $0x30] sm:$0xff] }
  0x1b   :  { %v152_v16 = vld [vmem:[%s1474_s2 + $0x38] sm:$0xff]  ;;  %v151_v17 = vld [vmem:[%s1474_s2 + $0x30] sm:$0xff]  ;;  %v36_v18 = vld [vmem:[%s1473_s1 + $0x48] sm:$0xff] }
  0x1c   :  { %v35_v19 = vld [vmem:[%s1473_s1 + $0x40] sm:$0xff]  ;;  %v154_v20 = vld [vmem:[%s1474_s2 + $0x48] sm:$0xff]  ;;  %v38_v22 = vld [vmem:[%s1473_s1 + $0x58] sm:$0xff] }
  0x1d   :  { %80 = vperm.xlu1 %1029, %v34_v14   ;;  %75 = vperm.xlu0 %1028, %v33_v15   ;;  %v153_v21 = vld [vmem:[%s1474_s2 + $0x40] sm:$0xff]  ;;  %v37_v23 = vld [vmem:[%s1473_s1 + $0x50] sm:$0xff]  ;;  %v156_v24 = vld [vmem:[%s1474_s2 + $0x58] sm:$0xff] }
  0x1e   :  { %v155_v25 = vld [vmem:[%s1474_s2 + $0x50] sm:$0xff]  ;;  %v40_v26 = vld [vmem:[%s1473_s1 + $0x68] sm:$0xff]  ;;  %v39_v27 = vld [vmem:[%s1473_s1 + $0x60] sm:$0xff] }
  0x1f   :  { %v158_v28 = vld [vmem:[%s1474_s2 + $0x68] sm:$0xff]  ;;  %v157_v29 = vld [vmem:[%s1474_s2 + $0x60] sm:$0xff]  ;;  %v42_v30 = vld [vmem:[%s1473_s1 + $0x78] sm:$0xff] }
  0x20   :  { %v41_v31 = vld [vmem:[%s1473_s1 + $0x70] sm:$0xff]  ;;  %v160_v32 = vld [vmem:[%s1474_s2 + $0x78] sm:$0xff]  ;;  %v563_v34 = vld [vmem:[%s1476_s4 + $0x8] sm:$0xff] }
  0x21   :  { %198 = vperm.xlu1 %1029, %v152_v16   ;;  %193 = vperm.xlu0 %1028, %v151_v17   ;;  %v159_v33 = vld [vmem:[%s1474_s2 + $0x70] sm:$0xff]  ;;  %v562_v35 = vld [vmem:[%s1476_s4] sm:$0xff]  ;;  %v565_v36 = vld [vmem:[%s1476_s4 + $0x18] sm:$0xff] }
  0x22   :  { %v564_v37 = vld [vmem:[%s1476_s4 + $0x10] sm:$0xff]  ;;  %v273_v38 = vld [vmem:[%s1475_s3] sm:$0xff]  ;;  %v567_v40 = vld [vmem:[%s1476_s4 + $0x28] sm:$0xff] }
  0x23   :  { %v289_v39 = vld [vmem:[%s1475_s3 + $0x80] sm:$0xff]  ;;  %930 = vmatprep.mubr.f32.mxu0 %v273_v38  ;;  %v569_v42 = vld [vmem:[%s1476_s4 + $0x38] sm:$0xff]  ;;  %v568_v43 = vld [vmem:[%s1476_s4 + $0x30] sm:$0xff] }
  0x24   :  { %v566_v41 = vld [vmem:[%s1476_s4 + $0x20] sm:$0xff]  ;;  %954 = vmatprep.mubr.f32.mxu1 %v289_v39  ;;  %v571_v44 = vld [vmem:[%s1476_s4 + $0x48] sm:$0xff]  ;;  %v573_v46 = vld [vmem:[%s1476_s4 + $0x58] sm:$0xff] }
  0x25   :  { %90 = vperm.xlu1 %1029, %v36_v18   ;;  %85 = vperm.xlu0 %1028, %v35_v19   ;;  %v570_v45 = vld [vmem:[%s1476_s4 + $0x40] sm:$0xff]  ;;  %v572_v47 = vld [vmem:[%s1476_s4 + $0x50] sm:$0xff]  ;;  %v575_v48 = vld [vmem:[%s1476_s4 + $0x68] sm:$0xff] }
  0x26   :  { %v574_v49 = vld [vmem:[%s1476_s4 + $0x60] sm:$0xff]  ;;  %v577_v50 = vld [vmem:[%s1476_s4 + $0x78] sm:$0xff]  ;;  %v576_v51 = vld [vmem:[%s1476_s4 + $0x70] sm:$0xff] }
  0x27   :  { %v579_v52 = vld [vmem:[%s1476_s4 + $0x88] sm:$0xff]  ;;  %v578_v53 = vld [vmem:[%s1476_s4 + $0x80] sm:$0xff]  ;;  %v581_v54 = vld [vmem:[%s1476_s4 + $0x98] sm:$0xff] }
  0x28   :  { %v580_v55 = vld [vmem:[%s1476_s4 + $0x90] sm:$0xff]  ;;  %v583_v56 = vld [vmem:[%s1476_s4 + $0xa8] sm:$0xff]  ;;  %v582_v57 = vld [vmem:[%s1476_s4 + $0xa0] sm:$0xff] }
  0x29   :  { %208 = vperm.xlu1 %1029, %v154_v20   ;;  %203 = vperm.xlu0 %1028, %v153_v21   ;;  %v585_v58 = vld [vmem:[%s1476_s4 + $0xb8] sm:$0xff]  ;;  %v584_v59 = vld [vmem:[%s1476_s4 + $0xb0] sm:$0xff]  ;;  %v587_v60 = vld [vmem:[%s1476_s4 + $0xc8] sm:$0xff] }
  0x2a   :  { %v586_v61 = vld [vmem:[%s1476_s4 + $0xc0] sm:$0xff]  ;;  %v589_v62 = vld [vmem:[%s1476_s4 + $0xd8] sm:$0xff]  ;;  %v588_v63 = vld [vmem:[%s1476_s4 + $0xd0] sm:$0xff] }
  0x2b   :  { %v591_v0 = vld [vmem:[%s1476_s4 + $0xe8] sm:$0xff]  ;;  %v590_v1 = vld [vmem:[%s1476_s4 + $0xe0] sm:$0xff]  ;;  %v593_v2 = vld [vmem:[%s1476_s4 + $0xf8] sm:$0xff] }
  0x2c   :  { %v592_v3 = vld [vmem:[%s1476_s4 + $0xf0] sm:$0xff]  ;;  %v1295_v4 = vld [vmem:[%s1472_s0] ss:$0 sm:$0xff] }
  0x2d   :  { %100 = vperm.xlu1 %1029, %v38_v22   ;;  %95 = vperm.xlu0 %1028, %v37_v23   ;;  %v823_v5 = vld [vmem:[#allocation2] sm:$0x1] }
  0x31   :  { %218 = vperm.xlu1 %1029, %v156_v24   ;;  %213 = vperm.xlu0 %1028, %v155_v25  }
  0x35   :  { %110 = vperm.xlu1 %1029, %v40_v26   ;;  %105 = vperm.xlu0 %1028, %v39_v27  }
  0x39   :  { %228 = vperm.xlu1 %1029, %v158_v28   ;;  %223 = vperm.xlu0 %1028, %v157_v29  }
  0x3d   :  { %120 = vperm.xlu1 %1029, %v42_v30   ;;  %115 = vperm.xlu0 %1028, %v41_v31  }
  0x41   :  { %238 = vperm.xlu1 %1029, %v160_v32   ;;  %233 = vperm.xlu0 %1028, %v159_v33  }
  0x45   :  { %601 = vperm.xlu1 %1029, %v563_v34   ;;  %596 = vperm.xlu0 %1028, %v562_v35  }
  0x49   :  { %611 = vperm.xlu1 %1029, %v565_v36   ;;  %606 = vperm.xlu0 %1028, %v564_v37  }
  0x4d   :  { %621 = vperm.xlu1 %1029, %v567_v40   ;;  %616 = vperm.xlu0 %1028, %v566_v41  }
  0x51   :  { %631 = vperm.xlu1 %1029, %v569_v42   ;;  %626 = vperm.xlu0 %1028, %v568_v43  }
  0x55   :  { %641 = vperm.xlu1 %1029, %v571_v44   ;;  %636 = vperm.xlu0 %1028, %v570_v45  }
  0x59   :  { %651 = vperm.xlu1 %1029, %v573_v46   ;;  %646 = vperm.xlu0 %1028, %v572_v47  }
  0x5d   :  { %661 = vperm.xlu1 %1029, %v575_v48   ;;  %656 = vperm.xlu0 %1028, %v574_v49  }
  0x61   :  { %671 = vperm.xlu1 %1029, %v577_v50   ;;  %666 = vperm.xlu0 %1028, %v576_v51  }
  0x65   :  { %681 = vperm.xlu1 %1029, %v579_v52   ;;  %676 = vperm.xlu0 %1028, %v578_v53  }
  0x69   :  { %691 = vperm.xlu1 %1029, %v581_v54   ;;  %686 = vperm.xlu0 %1028, %v580_v55  }
  0x6d   :  { %701 = vperm.xlu1 %1029, %v583_v56   ;;  %696 = vperm.xlu0 %1028, %v582_v57  }
  0x71   :  { %711 = vperm.xlu1 %1029, %v585_v58   ;;  %706 = vperm.xlu0 %1028, %v584_v59  }
  0x75   :  { %721 = vperm.xlu1 %1029, %v587_v60   ;;  %716 = vperm.xlu0 %1028, %v586_v61  }
  0x79   :  { %731 = vperm.xlu1 %1029, %v589_v62   ;;  %726 = vperm.xlu0 %1028, %v588_v63  }
  0x7d   :  { %741 = vperm.xlu1 %1029, %v591_v0   ;;  %736 = vperm.xlu0 %1028, %v590_v1  }
  0x81   :  { %751 = vperm.xlu1 %1029, %v593_v2   ;;  %746 = vperm.xlu0 %1028, %v592_v3  }
  0x84   :  { %v164_v6 = vpop.permute.xlu1 %163  ;;  %v46_v7 = vpop.permute.xlu0 %45 }
  0x85   :  { %v129_v8 = vmul.f32 %v1295_v4, %v46_v7  ;;  %826 = vperm.xlu0 %1028, %v823_v5  }
  0x87   :  { %v241_v11 = vadd.f32 %v164_v6, %v129_v8 }
  0x88   :  { %v169_v9 = vpop.permute.xlu1 %168  ;;  %v51_v10 = vpop.permute.xlu0 %50 }
  0x89   :  { %v130_v12 = vmul.f32 %v1295_v4, %v51_v10  ;;  %v257_v16 = vmax.f32 %v241_v11, 0.0 }
  0x8b   :  { %v242_v13 = vadd.f32 %v169_v9, %v130_v12 }
  0x8c   :  { %v61_v14 = vpop.permute.xlu1 %60  ;;  %v56_v15 = vpop.permute.xlu0 %55 }
  0x8d   :  { %v258_v17 = vmax.f32 %v242_v13, 0.0  ;;  %v132_v19 = vmul.f32 %v1295_v4, %v61_v14  ;;  %v131_v20 = vmul.f32 %v1295_v4, %v56_v15 }
  0x8f   :  { %v978_v18 = vpack.c.bf16 %v258_v17, %v257_v16 }
  0x90   :  { %v179_v21 = vpop.permute.xlu1 %178  ;;  %v174_v22 = vpop.permute.xlu0 %173 }
  0x91   :  { %v244_v23 = vadd.f32 %v179_v21, %v132_v19  ;;  %v243_v24 = vadd.f32 %v174_v22, %v131_v20  ;;  %979 = vmatprep.subr.bf16.mxu0 %v978_v18  ;;  %1010 = vmatprep.subr.bf16.mxu1 %v978_v18 }
  0x92   :  { %981 = vmatpush3.bf16.msra.mxu0 %v978_v18  ;;  %1018 = vmatpush3.bf16.msra.mxu1 %v978_v18 }
  0x93   :  { %v260_v25 = vmax.f32 %v244_v23, 0.0  ;;  %v259_v26 = vmax.f32 %v243_v24, 0.0 }
  0x94   :  { %v71_v27 = vpop.permute.xlu1 %70  ;;  %v66_v28 = vpop.permute.xlu0 %65 }
  0x95   :  { %v982_v29 = vpack.c.bf16 %v260_v25, %v259_v26  ;;  %v134_v30 = vmul.f32 %v1295_v4, %v71_v27  ;;  %v133_v31 = vmul.f32 %v1295_v4, %v66_v28 }
  0x97   :  { %983 = vmatprep.subr.bf16.mxu0 %v982_v29  ;;  %1011 = vmatprep.subr.bf16.mxu1 %v982_v29 }
  0x98   :  { %v189_v32 = vpop.permute.xlu1 %188  ;;  %v184_v33 = vpop.permute.xlu0 %183  ;;  %985 = vmatpush3.bf16.msra.mxu0 %v982_v29  ;;  %1019 = vmatpush3.bf16.msra.mxu1 %v982_v29 }
  0x99   :  { %v246_v34 = vadd.f32 %v189_v32, %v134_v30  ;;  %v245_v35 = vadd.f32 %v184_v33, %v133_v31  ;;  %v274_v31 = vld [vmem:[%s1475_s3 + $0x8] sm:$0xff]  ;;  %v275_v32 = vld [vmem:[%s1475_s3 + $0x10] sm:$0xff] }
  0x9a   :  { %v291_v33 = vld [vmem:[%s1475_s3 + $0x90] sm:$0xff] }
  0x9b   :  { %v262_v36 = vmax.f32 %v246_v34, 0.0  ;;  %v261_v37 = vmax.f32 %v245_v35, 0.0  ;;  %v276_v34 = vld [vmem:[%s1475_s3 + $0x18] sm:$0xff] }
  0x9c   :  { %v81_v38 = vpop.permute.xlu1 %80  ;;  %v76_v39 = vpop.permute.xlu0 %75  ;;  %v292_v35 = vld [vmem:[%s1475_s3 + $0x98] sm:$0xff] }
  0x9d   :  { %v986_v40 = vpack.c.bf16 %v262_v36, %v261_v37  ;;  %v136_v41 = vmul.f32 %v1295_v4, %v81_v38  ;;  %v135_v42 = vmul.f32 %v1295_v4, %v76_v39  ;;  %v277_v36 = vld [vmem:[%s1475_s3 + $0x20] sm:$0xff]  ;;  %v278_v38 = vld [vmem:[%s1475_s3 + $0x28] sm:$0xff] }
  0x9e   :  { %v293_v37 = vld [vmem:[%s1475_s3 + $0xa0] sm:$0xff]  ;;  %v294_v39 = vld [vmem:[%s1475_s3 + $0xa8] sm:$0xff] }
  0x9f   :  { %987 = vmatprep.subr.bf16.mxu0 %v986_v40  ;;  %1012 = vmatprep.subr.bf16.mxu1 %v986_v40 }
  0xa0   :  { %v199_v43 = vpop.permute.xlu1 %198  ;;  %v194_v44 = vpop.permute.xlu0 %193  ;;  %989 = vmatpush3.bf16.msra.mxu0 %v986_v40  ;;  %1020 = vmatpush3.bf16.msra.mxu1 %v986_v40  ;;  %v279_v40 = vld [vmem:[%s1475_s3 + $0x30] sm:$0xff] }
  0xa1   :  { %v248_v45 = vadd.f32 %v199_v43, %v136_v41  ;;  %v247_v46 = vadd.f32 %v194_v44, %v135_v42  ;;  %v295_v41 = vld [vmem:[%s1475_s3 + $0xb0] sm:$0xff]  ;;  %v280_v42 = vld [vmem:[%s1475_s3 + $0x38] sm:$0xff]  ;;  %v281_v44 = vld [vmem:[%s1475_s3 + $0x40] sm:$0xff] }
  0xa2   :  { %v296_v43 = vld [vmem:[%s1475_s3 + $0xb8] sm:$0xff] }
  0xa3   :  { %v264_v47 = vmax.f32 %v248_v45, 0.0  ;;  %v263_v48 = vmax.f32 %v247_v46, 0.0  ;;  %v297_v45 = vld [vmem:[%s1475_s3 + $0xc0] sm:$0xff]  ;;  %v282_v46 = vld [vmem:[%s1475_s3 + $0x48] sm:$0xff] }
  0xa4   :  { %v91_v49 = vpop.permute.xlu1 %90  ;;  %v86_v50 = vpop.permute.xlu0 %85 }
  0xa5   :  { %v990_v51 = vpack.c.bf16 %v264_v47, %v263_v48  ;;  %v138_v52 = vmul.f32 %v1295_v4, %v91_v49  ;;  %v137_v53 = vmul.f32 %v1295_v4, %v86_v50  ;;  %v298_v47 = vld [vmem:[%s1475_s3 + $0xc8] sm:$0xff]  ;;  %v283_v48 = vld [vmem:[%s1475_s3 + $0x50] sm:$0xff]  ;;  %v284_v50 = vld [vmem:[%s1475_s3 + $0x58] sm:$0xff] }
  0xa6   :  { %v299_v49 = vld [vmem:[%s1475_s3 + $0xd0] sm:$0xff] }
  0xa7   :  { %991 = vmatprep.subr.bf16.mxu0 %v990_v51  ;;  %1013 = vmatprep.subr.bf16.mxu1 %v990_v51 }
  0xa8   :  { %v209_v54 = vpop.permute.xlu1 %208  ;;  %v204_v55 = vpop.permute.xlu0 %203  ;;  %993 = vmatpush3.bf16.msra.mxu0 %v990_v51  ;;  %1021 = vmatpush3.bf16.msra.mxu1 %v990_v51  ;;  %v300_v51 = vld [vmem:[%s1475_s3 + $0xd8] sm:$0xff] }
  0xa9   :  { %v250_v56 = vadd.f32 %v209_v54, %v138_v52  ;;  %v249_v57 = vadd.f32 %v204_v55, %v137_v53  ;;  %v285_v52 = vld [vmem:[%s1475_s3 + $0x60] sm:$0xff]  ;;  %v286_v54 = vld [vmem:[%s1475_s3 + $0x68] sm:$0xff] }
  0xaa   :  { %v301_v53 = vld [vmem:[%s1475_s3 + $0xe0] sm:$0xff]  ;;  %v302_v55 = vld [vmem:[%s1475_s3 + $0xe8] sm:$0xff] }
  0xab   :  { %v266_v58 = vmax.f32 %v250_v56, 0.0  ;;  %v265_v59 = vmax.f32 %v249_v57, 0.0  ;;  %v287_v56 = vld [vmem:[%s1475_s3 + $0x70] sm:$0xff] }
  0xac   :  { %v101_v60 = vpop.permute.xlu1 %100  ;;  %v96_v61 = vpop.permute.xlu0 %95  ;;  %v303_v57 = vld [vmem:[%s1475_s3 + $0xf0] sm:$0xff] }
  0xad   :  { %v994_v62 = vpack.c.bf16 %v266_v58, %v265_v59  ;;  %v140_v63 = vmul.f32 %v1295_v4, %v101_v60  ;;  %v139_v0 = vmul.f32 %v1295_v4, %v96_v61  ;;  %v288_v58 = vld [vmem:[%s1475_s3 + $0x78] sm:$0xff] }
  0xae   :  { %v304_v59 = vld [vmem:[%s1475_s3 + $0xf8] sm:$0xff] }
  0xaf   :  { %995 = vmatprep.subr.bf16.mxu0 %v994_v62  ;;  %1014 = vmatprep.subr.bf16.mxu1 %v994_v62 }
  0xb0   :  { %v219_v1 = vpop.permute.xlu1 %218  ;;  %v214_v2 = vpop.permute.xlu0 %213  ;;  %997 = vmatpush3.bf16.msra.mxu0 %v994_v62  ;;  %1022 = vmatpush3.bf16.msra.mxu1 %v994_v62 }
  0xb1   :  { %v252_v3 = vadd.f32 %v219_v1, %v140_v63  ;;  %v251_v5 = vadd.f32 %v214_v2, %v139_v0 }
  0xb3   :  { %v268_v6 = vmax.f32 %v252_v3, 0.0  ;;  %v267_v7 = vmax.f32 %v251_v5, 0.0 }
  0xb4   :  { %v111_v8 = vpop.permute.xlu1 %110  ;;  %v106_v9 = vpop.permute.xlu0 %105 }
  0xb5   :  { %v998_v10 = vpack.c.bf16 %v268_v6, %v267_v7  ;;  %v142_v11 = vmul.f32 %v1295_v4, %v111_v8  ;;  %v141_v12 = vmul.f32 %v1295_v4, %v106_v9 }
  0xb7   :  { %999 = vmatprep.subr.bf16.mxu0 %v998_v10  ;;  %1015 = vmatprep.subr.bf16.mxu1 %v998_v10 }
  0xb8   :  { %v229_v13 = vpop.permute.xlu1 %228  ;;  %v224_v14 = vpop.permute.xlu0 %223  ;;  %1001 = vmatpush3.bf16.msra.mxu0 %v998_v10  ;;  %1023 = vmatpush3.bf16.msra.mxu1 %v998_v10 }
  0xb9   :  { %v254_v15 = vadd.f32 %v229_v13, %v142_v11  ;;  %v253_v16 = vadd.f32 %v224_v14, %v141_v12 }
  0xbb   :  { %v270_v17 = vmax.f32 %v254_v15, 0.0  ;;  %v269_v18 = vmax.f32 %v253_v16, 0.0 }
  0xbc   :  { %v121_v19 = vpop.permute.xlu1 %120  ;;  %v116_v20 = vpop.permute.xlu0 %115 }
  0xbd   :  { %v1002_v21 = vpack.c.bf16 %v270_v17, %v269_v18  ;;  %v144_v22 = vmul.f32 %v1295_v4, %v121_v19  ;;  %v143_v23 = vmul.f32 %v1295_v4, %v116_v20  ;;  %v290_v4 = vld [vmem:[%s1475_s3 + $0x88] sm:$0xff]  ;;  %s1055_s3 = smov [#allocation3]  }
  0xbe   :  { %s841_s26 = sshll.u32 %s1055_s3, 4  ;;  %s842_s26 = int_to_ptr.vmem [resolvable:$true] %s841_s26 }
  0xbf   :  { %1003 = vmatprep.subr.bf16.mxu0 %v1002_v21  ;;  %1016 = vmatprep.subr.bf16.mxu1 %v1002_v21  ;;  %s1030_s27 = scalar_lea.vmem %s842_s26, 16  ;;  %s1034_s28 = scalar_lea.vmem %s842_s26, 32 }
  0xc0   :  { %v239_v24 = vpop.permute.xlu1 %238  ;;  %v234_v25 = vpop.permute.xlu0 %233  ;;  %1005 = vmatpush3.bf16.msra.mxu0 %v1002_v21  ;;  %1024 = vmatpush3.bf16.msra.mxu1 %v1002_v21  ;;  %p1031_p0 = scmp.ne.s32.totalorder %s842_s26, %s1030_s27  ;;  %p1035_p1 = scmp.lt.s32.totalorder %s842_s26, %s842_s26 }
  0xc1   :  { %v256_v26 = vadd.f32 %v239_v24, %v144_v22  ;;  %v255_v27 = vadd.f32 %v234_v25, %v143_v23  ;;  %p1036_p2 = scmp.lt.s32.totalorder %s1034_s28, %s1030_s27 }
  0xc3   :  { %v272_v28 = vmax.f32 %v256_v26, 0.0  ;;  %v271_v29 = vmax.f32 %v255_v27, 0.0  ;;  %p1037_p3 = por %p1036_p2, %p1035_p1 }
  0xc4   :  { %v602_v60 = vpop.permute.xlu1 %601  ;;  %v597_v61 = vpop.permute.xlu0 %596 }
  0xc5   :  { %v1006_v30 = vpack.c.bf16 %v272_v28, %v271_v29  ;;  %p1038_p4 = pnand %p1037_p3, %p1031_p0 }
  0xc7   :  { %1007 = vmatprep.subr.bf16.mxu0 %v1006_v30  ;;  %1017 = vmatprep.subr.bf16.mxu1 %v1006_v30 }
  0xc8   :  { %1009 = vmatpush3.bf16.msra.mxu0 %v1006_v30  ;;  %1025 = vmatpush3.bf16.msra.mxu1 %v1006_v30  ;;  %v612_v62 = vpop.permute.xlu1 %611  ;;  %v607_v63 = vpop.permute.xlu0 %606 }
  0xcb   :  { %931 = vmatmul.mubr.f32.vlgmr.msra.gmra.mrb[0].mxu0 %v274_v31  ;;  %955 = vmatmul.mubr.f32.vlgmr.msra.gmra.mrb[0].mxu1 %v290_v4 }
  0xcc   :  { %933 = vmatprep.mubr.f32.mxu0 %v275_v32  ;;  %957 = vmatprep.mubr.f32.mxu1 %v291_v33  ;;  %v622_v0 = vpop.permute.xlu1 %621  ;;  %v617_v1 = vpop.permute.xlu0 %616 }
  0xcf   :  { %934 = vmatmul.mubr.f32.gmra.mrb[2].mxu0 %v276_v34  ;;  %958 = vmatmul.mubr.f32.gmra.mrb[2].mxu1 %v292_v35 }
  0xd0   :  { %936 = vmatprep.mubr.f32.mxu0 %v277_v36  ;;  %960 = vmatprep.mubr.f32.mxu1 %v293_v37  ;;  %v632_v2 = vpop.permute.xlu1 %631  ;;  %v627_v3 = vpop.permute.xlu0 %626 }
  0xd3   :  { %937 = vmatmul.mubr.f32.gmra.mrb[4].mxu0 %v278_v38  ;;  %961 = vmatmul.mubr.f32.gmra.mrb[4].mxu1 %v294_v39 }
  0xd4   :  { %939 = vmatprep.mubr.f32.mxu0 %v279_v40  ;;  %963 = vmatprep.mubr.f32.mxu1 %v295_v41  ;;  %v642_v5 = vpop.permute.xlu1 %641  ;;  %v637_v6 = vpop.permute.xlu0 %636 }
  0xd7   :  { %940 = vmatmul.mubr.f32.gmra.mrb[6].mxu0 %v280_v42  ;;  %964 = vmatmul.mubr.f32.gmra.mrb[6].mxu1 %v296_v43 }
  0xd8   :  { %942 = vmatprep.mubr.f32.mxu0 %v281_v44  ;;  %966 = vmatprep.mubr.f32.mxu1 %v297_v45  ;;  %v1403_v7 = vpop.permute.xlu1 %651  ;;  %v647_v8 = vpop.permute.xlu0 %646 }
  0xdb   :  { %943 = vmatmul.mubr.f32.gmra.mrb[8].mxu0 %v282_v46  ;;  %967 = vmatmul.mubr.f32.gmra.mrb[8].mxu1 %v298_v47 }
  0xdc   :  { %945 = vmatprep.mubr.f32.mxu0 %v283_v48  ;;  %969 = vmatprep.mubr.f32.mxu1 %v299_v49  ;;  %v1409_v15 = vpop.permute.xlu1 %661  ;;  %v1411_v16 = vpop.permute.xlu0 %656 }
  0xdf   :  { %946 = vmatmul.mubr.f32.gmra.mrb[10].mxu0 %v284_v50  ;;  %970 = vmatmul.mubr.f32.gmra.mrb[10].mxu1 %v300_v51 }
  0xe0   :  { %948 = vmatprep.mubr.f32.mxu0 %v285_v52  ;;  %972 = vmatprep.mubr.f32.mxu1 %v301_v53  ;;  %v672_v34 = vpop.permute.xlu1 %671  ;;  %v667_v35 = vpop.permute.xlu0 %666 }
  0xe3   :  { %949 = vmatmul.mubr.f32.gmra.mrb[12].mxu0 %v286_v54  ;;  %973 = vmatmul.mubr.f32.gmra.mrb[12].mxu1 %v302_v55 }
  0xe4   :  { %951 = vmatprep.mubr.f32.mxu0 %v287_v56  ;;  %975 = vmatprep.mubr.f32.mxu1 %v303_v57  ;;  %v682_v56 = vpop.permute.xlu1 %681  ;;  %v677_v57 = vpop.permute.xlu0 %676 }
  0xe7   :  { %952 = vmatmul.mubr.f32.gmra.mrb[14].mxu0 %v288_v58  ;;  %976 = vmatmul.mubr.f32.gmra.mrb[14].mxu1 %v304_v59 }
 0x19e   :  { %v932_v9 = vpop.f32.mrb[0].mxu0  ;;  %v1405_v10 = vpop.f32.mrb[0].mxu1 }
 0x19f   :  { %v531_v11 = vmax.f32 %v932_v9, 0.0  ;;  %v371_v12 = vpop.f32.mrb[1].mxu0  ;;  %v1407_v13 = vpop.f32.mrb[1].mxu1 }
 0x1a0   :  { %v530_v14 = vmax.f32 %v371_v12, 0.0 }
 0x1a1   :  { %v755_v17 = vmul.f32 %v602_v60, %v531_v11 }
 0x1a2   :  { %v754_v18 = vmul.f32 %v597_v61, %v530_v14  ;;  %v935_v19 = vpop.f32.mrb[2].mxu0  ;;  %v1413_v20 = vpop.f32.mrb[2].mxu1 }
 0x1a3   :  { %v381_v21 = vpop.f32.mrb[3].mxu0  ;;  %v1415_v22 = vpop.f32.mrb[3].mxu1  ;;  %v533_v24 = vmax.f32 %v935_v19, 0.0 }
 0x1a4   :  { %v786_v23 = vadd.f32 %v755_v17, %v754_v18  ;;  %v532_v25 = vmax.f32 %v381_v21, 0.0 }
 0x1a5   :  { %v757_v31 = vmul.f32 %v612_v62, %v533_v24  ;;  %v692_v24 = vpop.permute.xlu1 %691 }
 0x1a6   :  { %v756_v26 = vmul.f32 %v607_v63, %v532_v25  ;;  %v938_v27 = vpop.f32.mrb[4].mxu0  ;;  %v1417_v28 = vpop.f32.mrb[4].mxu1 }
 0x1a7   :  { %v391_v29 = vpop.f32.mrb[5].mxu0  ;;  %v1419_v30 = vpop.f32.mrb[5].mxu1  ;;  %v535_v32 = vmax.f32 %v938_v27, 0.0 }
 0x1a8   :  { %v787_v4 = vadd.f32 %v786_v23, %v756_v26  ;;  %v534_v33 = vmax.f32 %v391_v29, 0.0  ;;  %v687_v25 = vpop.permute.xlu0 %686 }
 0x1a9   :  { %v759_v42 = vmul.f32 %v622_v0, %v535_v32 }
 0x1aa   :  { %v758_v36 = vmul.f32 %v617_v1, %v534_v33  ;;  %v788_v37 = vadd.f32 %v787_v4, %v757_v31  ;;  %v941_v38 = vpop.f32.mrb[6].mxu0  ;;  %v1421_v39 = vpop.f32.mrb[6].mxu1 }
 0x1ab   :  { %v401_v40 = vpop.f32.mrb[7].mxu0  ;;  %v1423_v41 = vpop.f32.mrb[7].mxu1  ;;  %v537_v44 = vmax.f32 %v941_v38, 0.0 }
 0x1ac   :  { %v789_v43 = vadd.f32 %v788_v37, %v758_v36  ;;  %v536_v45 = vmax.f32 %v401_v40, 0.0  ;;  %v697_v40 = vpop.permute.xlu0 %696 }
 0x1ad   :  { %v761_v52 = vmul.f32 %v632_v2, %v537_v44  ;;  %v702_v44 = vpop.permute.xlu1 %701 }
 0x1ae   :  { %v760_v46 = vmul.f32 %v627_v3, %v536_v45  ;;  %v790_v47 = vadd.f32 %v789_v43, %v759_v42  ;;  %v944_v48 = vpop.f32.mrb[8].mxu0  ;;  %v1425_v49 = vpop.f32.mrb[8].mxu1  ;;  %v547_v42 = vmax.f32 %v1405_v10, 0.0  ;;  %v551_v10 = vmax.f32 %v1417_v28, 0.0 }
 0x1af   :  { %v411_v50 = vpop.f32.mrb[9].mxu0  ;;  %v1427_v51 = vpop.f32.mrb[9].mxu1  ;;  %v539_v54 = vmax.f32 %v944_v48, 0.0 }
 0x1b0   :  { %v791_v53 = vadd.f32 %v790_v47, %v760_v46  ;;  %v538_v55 = vmax.f32 %v411_v50, 0.0  ;;  %v548_v46 = vmax.f32 %v1415_v22, 0.0  ;;  %v771_v48 = vmul.f32 %v682_v56, %v547_v42 }
 0x1b1   :  { %v763_v0 = vmul.f32 %v642_v5, %v539_v54  ;;  %v712_v54 = vpop.permute.xlu1 %711  ;;  %v553_v56 = vmax.f32 %v1421_v39, 0.0 }
 0x1b2   :  { %v762_v58 = vmul.f32 %v637_v6, %v538_v55  ;;  %v792_v59 = vadd.f32 %v791_v53, %v761_v52  ;;  %v947_v60 = vpop.f32.mrb[10].mxu0  ;;  %v1429_v61 = vpop.f32.mrb[10].mxu1  ;;  %v772_v53 = vmul.f32 %v687_v25, %v548_v46 }
 0x1b3   :  { %v421_v62 = vpop.f32.mrb[11].mxu0  ;;  %v1431_v63 = vpop.f32.mrb[11].mxu1  ;;  %v541_v3 = vmax.f32 %v947_v60, 0.0  ;;  %v775_v60 = vmul.f32 %v702_v44, %v551_v10 }
 0x1b4   :  { %v793_v1 = vadd.f32 %v792_v59, %v762_v58  ;;  %v540_v9 = vmax.f32 %v421_v62, 0.0  ;;  %v707_v52 = vpop.permute.xlu0 %706 }
 0x1b5   :  { %v765_v6 = vmul.f32 %v1403_v7, %v541_v3  ;;  %v546_v7 = vmax.f32 %v1407_v13, 0.0  ;;  %v550_v13 = vmax.f32 %v1419_v30, 0.0  ;;  %v722_v62 = vpop.permute.xlu1 %721  ;;  %v777_v3 = vmul.f32 %v712_v54, %v553_v56 }
 0x1b6   :  { %v764_v11 = vmul.f32 %v647_v8, %v540_v9  ;;  %v794_v12 = vadd.f32 %v793_v1, %v763_v0  ;;  %v950_v2 = vpop.f32.mrb[12].mxu0  ;;  %v1433_v14 = vpop.f32.mrb[12].mxu1  ;;  %v554_v1 = vmax.f32 %v1427_v51, 0.0  ;;  %v555_v9 = vmax.f32 %v1425_v49, 0.0 }
 0x1b7   :  { %v431_v17 = vpop.f32.mrb[13].mxu0  ;;  %v1435_v18 = vpop.f32.mrb[13].mxu1  ;;  %v543_v21 = vmax.f32 %v950_v2, 0.0  ;;  %v770_v45 = vmul.f32 %v677_v57, %v546_v7  ;;  %v774_v58 = vmul.f32 %v697_v40, %v550_v13  ;;  %v552_v57 = vmax.f32 %v1423_v41, 0.0 }
 0x1b8   :  { %v795_v19 = vadd.f32 %v794_v12, %v764_v11  ;;  %v542_v23 = vmax.f32 %v431_v17, 0.0  ;;  %v717_v22 = vpop.permute.xlu0 %716  ;;  %v556_v2 = vmax.f32 %v1431_v63, 0.0  ;;  %v829_v40 = vlaneseq }
 0x1b9   :  { %v767_v4 = vmul.f32 %v1409_v15, %v543_v21  ;;  %v549_v15 = vmax.f32 %v1413_v20, 0.0  ;;  %v776_v0 = vmul.f32 %v707_v52, %v552_v57  ;;  %v778_v12 = vmul.f32 %v717_v22, %v554_v1  ;;  %v732_v17 = vpop.permute.xlu1 %731 }
 0x1ba   :  { %v766_v5 = vmul.f32 %v1411_v16, %v542_v23  ;;  %v796_v26 = vadd.f32 %v795_v19, %v765_v6  ;;  %v953_v27 = vpop.f32.mrb[14].mxu0  ;;  %v1439_v29 = vpop.f32.mrb[14].mxu1  ;;  %v779_v6 = vmul.f32 %v722_v62, %v555_v9  ;;  %v557_v19 = vmax.f32 %v1429_v61, 0.0 }
 0x1bb   :  { %v441_v8 = vpop.f32.mrb[15].mxu0  ;;  %v1441_v31 = vpop.f32.mrb[15].mxu1  ;;  %v545_v33 = vmax.f32 %v953_v27, 0.0  ;;  %v773_v55 = vmul.f32 %v692_v24, %v549_v15  ;;  %v558_v23 = vmax.f32 %v1435_v18, 0.0 }
 0x1bc   :  { %v797_v32 = vadd.f32 %v796_v26, %v766_v5  ;;  %v544_v36 = vmax.f32 %v441_v8, 0.0  ;;  %v727_v28 = vpop.permute.xlu0 %726  ;;  %v781_v25 = vmul.f32 %v732_v17, %v557_v19  ;;  %v559_v5 = vmax.f32 %v1433_v14, 0.0 }
 0x1bd   :  { %v769_v16 = vmul.f32 %v672_v34, %v545_v33  ;;  %v780_v21 = vmul.f32 %v727_v28, %v556_v2  ;;  %v742_v26 = vpop.permute.xlu1 %741  ;;  %v560_v8 = vmax.f32 %v1441_v31, 0.0  ;;  %v830_v14 = vshrl.u32 %v829_v40, 7 }
 0x1be   :  { %v768_v37 = vmul.f32 %v667_v35, %v544_v36  ;;  %v798_v38 = vadd.f32 %v797_v32, %v767_v4  ;;  %v783_v4 = vmul.f32 %v742_v26, %v559_v5  ;;  %v561_v32 = vmax.f32 %v1439_v29, 0.0 }
 0x1c0   :  { %v799_v43 = vadd.f32 %v798_v38, %v768_v37  ;;  %v737_v51 = vpop.permute.xlu0 %736 }
 0x1c1   :  { %v782_v27 = vmul.f32 %v737_v51, %v558_v23  ;;  %v752_v37 = vpop.permute.xlu1 %751 }
 0x1c2   :  { %v800_v47 = vadd.f32 %v799_v43, %v769_v16  ;;  %v785_v18 = vmul.f32 %v752_v37, %v561_v32 }
 0x1c4   :  { %v801_v50 = vadd.f32 %v800_v47, %v770_v45  ;;  %v747_v61 = vpop.permute.xlu0 %746  ;;  %v831_v45 = vsub.s32 0, %v830_v14 }
 0x1c5   :  { %v784_v36 = vmul.f32 %v747_v61, %v560_v8 }
 0x1c6   :  { %v802_v35 = vadd.f32 %v801_v50, %v771_v48 }
 0x1c8   :  { %v803_v34 = vadd.f32 %v802_v35, %v772_v53  ;;  %v827_v31 = vpop.permute.xlu0 %826 }
 0x1c9   :  { %v832_v29 = vrot.slane %v827_v31, %v831_v45 }
 0x1ca   :  { %v804_v59 = vadd.f32 %v803_v34, %v773_v55 }
 0x1cc   :  { %v805_v20 = vadd.f32 %v804_v59, %v774_v58 }
 0x1ce   :  { %v806_v30 = vadd.f32 %v805_v20, %v775_v60 }
 0x1d0   :  { %v807_v11 = vadd.f32 %v806_v30, %v776_v0 }
 0x1d2   :  { %v808_v41 = vadd.f32 %v807_v11, %v777_v3 }
 0x1d4   :  { %v809_v39 = vadd.f32 %v808_v41, %v778_v12 }
 0x1d6   :  { %v810_v24 = vadd.f32 %v809_v39, %v779_v6 }
 0x1d8   :  { %v811_v49 = vadd.f32 %v810_v24, %v780_v21 }
 0x1da   :  { %v812_v63 = vadd.f32 %v811_v49, %v781_v25 }
 0x1dc   :  { %v813_v33 = vadd.f32 %v812_v63, %v782_v27 }
 0x1de   :  { %v814_v7 = vadd.f32 %v813_v33, %v783_v4 }
 0x1e0   :  { %v815_v38 = vadd.f32 %v814_v7, %v784_v36 }
 0x1e2   :  { %v816_v42 = vadd.f32 %v815_v38, %v785_v18 }
 0x1e4   :  { %v817_v16 = vrot.slane %v816_v42, 4 }
 0x1e6   :  { %v818_v43 = vadd.f32 %v817_v16, %v816_v42 }
 0x1e8   :  { %v819_v44 = vrot.slane %v818_v43, 2 }
 0x1ea   :  { %v820_v46 = vadd.f32 %v819_v44, %v818_v43 }
 0x1ec   :  { %v821_v47 = vrot.slane %v820_v46, 1 }
 0x1ee   :  { %v822_v48 = vadd.f32 %v821_v47, %v820_v46 }
 0x1f0   :  { %v833_v15 = vadd.f32 %v832_v29, %v822_v48 }
 0x1f2   :  { %834 = vst [vmem:[#allocation3] sm:$0x1] %v833_v15 }
 0x1f3   :  { %1041 = shalt.err (!%p1038_p4)
}
 0x1f4   :  { %s1042_s30 = scalar_lea.hbm %s1478_s6, 16 }
 0x1f5   :  { %p1043_p5 = scmp.ne.s32.totalorder %s1478_s6, %s1042_s30  ;;  %p1046_p6 = scmp.lt.u32.totalorder %s1042_s30, %s1478_s6 }
 0x1f7   :  { %p1048_p7 = pnand %p1046_p6, %p1043_p5 }
 0x1f9   :  { %1051 = shalt.err (!%p1048_p7)
}
 0x1fa   :  { %844 = dma.vmem_to_hbm [thread:$0]  %s842_s26, 16, %s1478_s6, [#allocation4]  }
 0x1fb   :  { %1052 = dma.done.wait [#allocation4], 16  }
 0x1fc   :  { %1053 = vsyncadd [#allocation4], 4294967280 }
 0x1fd   :  { %848 = vsyncpa [#allocation4], 1 }

</bundles_post_ra>
